<compile_context>
chip_gen: v5e
topology: v5e:2x2
jax: 0.10.0
libtpu: 0.0.40
codegen_flags: <defaults>
</compile_context>

<pallas_src>
import functools

import jax
import jax.numpy as jnp
from jax import lax
from jax.experimental import pallas as pl
from jax.experimental.pallas import tpu as pltpu


# ---------------------------------------------------------------------------
# Tile-size helpers (sublane dims want multiples of 8, lane dims multiples of 128;
# a tile equal to the full dim is always legal).
# ---------------------------------------------------------------------------
def _sublane_tile(dim, preferred=256):
    for t in (preferred, 256, 128, 64, 32, 16, 8):
        if t <= dim and dim % t == 0:
            return t
    return dim


def _lane_tile(dim, preferred=256):
    for t in (preferred, 256, 128):
        if t <= dim and dim % t == 0:
            return t
    return dim


# ---------------------------------------------------------------------------
# Fused Q/K/V projection: q = (x @ Wq + bq) * (1/sqrt(Dh)), k = x @ Wk + bk, ...
# ---------------------------------------------------------------------------
def _qkv_proj_kernel(x_ref, wq_ref, bq_ref, wk_ref, bk_ref, wv_ref, bv_ref,
                     q_ref, k_ref, v_ref, qacc, kacc, vacc, *, q_scale):
    kstep = pl.program_id(2)

    @pl.when(kstep == 0)
    def _():
        qacc[...] = jnp.zeros_like(qacc)
        kacc[...] = jnp.zeros_like(kacc)
        vacc[...] = jnp.zeros_like(vacc)

    x = x_ref[...]
    qacc[...] += jnp.dot(x, wq_ref[...], preferred_element_type=jnp.float32)
    kacc[...] += jnp.dot(x, wk_ref[...], preferred_element_type=jnp.float32)
    vacc[...] += jnp.dot(x, wv_ref[...], preferred_element_type=jnp.float32)

    @pl.when(kstep == pl.num_programs(2) - 1)
    def _():
        # Fold the attention scale into q here (cheaper than scaling (s, s) scores).
        q_ref[...] = ((qacc[...] + bq_ref[...]) * q_scale).astype(q_ref.dtype)
        k_ref[...] = (kacc[...] + bk_ref[...]).astype(k_ref.dtype)
        v_ref[...] = (vacc[...] + bv_ref[...]).astype(v_ref.dtype)


def _qkv_projection(x2d, wq, bq, wk, bk, wv, bv, *, q_scale):
    m, kdim = x2d.shape
    n = wq.shape[1]
    tm = _sublane_tile(m)
    tn = _lane_tile(n)
    tk = _lane_tile(kdim)

    x_spec = pl.BlockSpec((tm, tk), lambda i, j, k: (i, k))
    w_spec = pl.BlockSpec((tk, tn), lambda i, j, k: (k, j))
    b_spec = pl.BlockSpec((1, tn), lambda i, j, k: (0, j))
    o_spec = pl.BlockSpec((tm, tn), lambda i, j, k: (i, j))
    o_shape = jax.ShapeDtypeStruct((m, n), x2d.dtype)

    kernel = functools.partial(_qkv_proj_kernel, q_scale=q_scale)
    return pl.pallas_call(
        kernel,
        out_shape=(o_shape, o_shape, o_shape),
        grid=(m // tm, n // tn, kdim // tk),
        in_specs=[x_spec, w_spec, b_spec, w_spec, b_spec, w_spec, b_spec],
        out_specs=(o_spec, o_spec, o_spec),
        scratch_shapes=[pltpu.VMEM((tm, tn), jnp.float32),
                        pltpu.VMEM((tm, tn), jnp.float32),
                        pltpu.VMEM((tm, tn), jnp.float32)],
        compiler_params=pltpu.CompilerParams(
            dimension_semantics=("parallel", "parallel", "arbitrary")),
    )(x2d, wq, bq, wk, bk, wv, bv)


# ---------------------------------------------------------------------------
# Generic tiled linear (used for the output projection).
# ---------------------------------------------------------------------------
def _linear_kernel(x_ref, w_ref, b_ref, o_ref, acc_ref):
    kstep = pl.program_id(2)

    @pl.when(kstep == 0)
    def _():
        acc_ref[...] = jnp.zeros_like(acc_ref)

    acc_ref[...] += jnp.dot(x_ref[...], w_ref[...], preferred_element_type=jnp.float32)

    @pl.when(kstep == pl.num_programs(2) - 1)
    def _():
        o_ref[...] = (acc_ref[...] + b_ref[...]).astype(o_ref.dtype)


def _linear(x2d, w, b):
    m, kdim = x2d.shape
    n = w.shape[1]
    tm = _sublane_tile(m)
    tn = _lane_tile(n)
    tk = _lane_tile(kdim)

    return pl.pallas_call(
        _linear_kernel,
        out_shape=jax.ShapeDtypeStruct((m, n), x2d.dtype),
        grid=(m // tm, n // tn, kdim // tk),
        in_specs=[pl.BlockSpec((tm, tk), lambda i, j, k: (i, k)),
                  pl.BlockSpec((tk, tn), lambda i, j, k: (k, j)),
                  pl.BlockSpec((1, tn), lambda i, j, k: (0, j))],
        out_specs=pl.BlockSpec((tm, tn), lambda i, j, k: (i, j)),
        scratch_shapes=[pltpu.VMEM((tm, tn), jnp.float32)],
        compiler_params=pltpu.CompilerParams(
            dimension_semantics=("parallel", "parallel", "arbitrary")),
    )(x2d, w, b)


# ---------------------------------------------------------------------------
# Flash attention: online softmax over kv tiles, heads batched per grid step.
# q is expected pre-scaled by 1/sqrt(head_dim).
# ---------------------------------------------------------------------------
def _flash_attn_kernel(q_ref, k_ref, v_ref, o_ref, m_sc, l_sc, acc_sc,
                       *, causal, tq, tk):
    qi = pl.program_id(1)
    ki = pl.program_id(2)

    @pl.when(ki == 0)
    def _():
        m_sc[...] = jnp.full_like(m_sc, -jnp.inf)
        l_sc[...] = jnp.zeros_like(l_sc)
        acc_sc[...] = jnp.zeros_like(acc_sc)

    def _tile_update():
        q = q_ref[0]   # (H, tq, Dh), already scaled
        k = k_ref[0]   # (H, tk, Dh)
        v = v_ref[0]   # (H, tk, Dh)
        # Heads batched in one contraction; the k transpose is absorbed into the
        # dot dimension numbers (no explicit XLU transpose).
        scores = jnp.einsum("hqd,hkd->hqk", q, k,
                            preferred_element_type=jnp.float32)   # (H, tq, tk)
        if causal:
            # Mask computed once per tile (shared across heads).
            row = qi * tq + lax.broadcasted_iota(jnp.int32, (1, tq, tk), 1)
            col = ki * tk + lax.broadcasted_iota(jnp.int32, (1, tq, tk), 2)
            scores = jnp.where(col > row, -jnp.inf, scores)
        m_prev = m_sc[...]
        m_new = jnp.maximum(m_prev, scores.max(axis=-1, keepdims=True))
        alpha = jnp.exp(m_prev - m_new)
        p = jnp.exp(scores - m_new)
        l_sc[...] = alpha * l_sc[...] + p.sum(axis=-1, keepdims=True)
        acc_sc[...] = alpha * acc_sc[...] + jnp.einsum(
            "hqk,hkd->hqd", p.astype(v.dtype), v,
            preferred_element_type=jnp.float32)
        m_sc[...] = m_new

    if causal:
        # Skip kv tiles that lie entirely above the diagonal for this q tile.
        # (kv tile 0 is never skipped, so the running max is finite before any
        #  fully-masked rows appear -> no -inf - -inf NaN hazard.)
        @pl.when(ki * tk <= qi * tq + (tq - 1))
        def _():
            _tile_update()
    else:
        _tile_update()

    @pl.when(ki == pl.num_programs(2) - 1)
    def _():
        # approx=True would move this fully onto the EUP but loosens accuracy.
        inv_l = pl.reciprocal(l_sc[...], approx=False)
        o_ref[0] = (acc_sc[...] * inv_l).astype(o_ref.dtype)


def _flash_attention(q, k, v, *, causal):
    # q, k, v: (b, H, s, Dh)
    b, h, s, dh = q.shape
    tq = _sublane_tile(s, preferred=256)   # 256 suits v6e/v7x; use 128 on v5e
    tk = _sublane_tile(s, preferred=256)

    kernel = functools.partial(_flash_attn_kernel, causal=causal, tq=tq, tk=tk)
    q_spec = pl.BlockSpec((1, h, tq, dh), lambda bi, qi, ki: (bi, 0, qi, 0))
    kv_spec = pl.BlockSpec((1, h, tk, dh), lambda bi, qi, ki: (bi, 0, ki, 0))
    o_spec = pl.BlockSpec((1, h, tq, dh), lambda bi, qi, ki: (bi, 0, qi, 0))

    return pl.pallas_call(
        kernel,
        out_shape=jax.ShapeDtypeStruct((b, h, s, dh), q.dtype),
        grid=(b, s // tq, s // tk),
        in_specs=[q_spec, kv_spec, kv_spec],
        out_specs=o_spec,
        scratch_shapes=[pltpu.VMEM((h, tq, 1), jnp.float32),
                        pltpu.VMEM((h, tq, 1), jnp.float32),
                        pltpu.VMEM((h, tq, dh), jnp.float32)],
        compiler_params=pltpu.CompilerParams(
            dimension_semantics=("parallel", "parallel", "arbitrary")),
    )(q, k, v)


# ---------------------------------------------------------------------------
# Full forward pass.
# ---------------------------------------------------------------------------
def self_attention(x, params, *, n_heads, causal=False):
    """x: (b, s, e). params: (wq, bq, wk, bk, wv, bv, wo, bo).

    Weights are (in_features, out_features); biases are (1, out_features).
    """
    wq, bq, wk, bk, wv, bv, wo, bo = params
    b, s, e = x.shape
    assert e % n_heads == 0
    head_dim = e // n_heads

    x2d = x.reshape(b * s, e)
    q_scale = 1.0 / float(head_dim) ** 0.5
    q2d, k2d, v2d = _qkv_projection(x2d, wq, bq, wk, bk, wv, bv, q_scale=q_scale)

    # Head split/merge is pure layout plumbing done in XLA between the kernels.
    def split_heads(t):
        return t.reshape(b, s, n_heads, head_dim).transpose(0, 2, 1, 3)

    ctx = _flash_attention(split_heads(q2d), split_heads(k2d), split_heads(v2d),
                           causal=causal)                       # (b, H, s, Dh)
    ctx2d = ctx.transpose(0, 2, 1, 3).reshape(b * s, e)         # concat heads
    out2d = _linear(ctx2d, wo, bo)
    return out2d.reshape(b, s, e)


# ---------------------------------------------------------------------------
# Pure-JAX reference of the (intended) PyTorch forward.
# ---------------------------------------------------------------------------
def _reference(x, params, n_heads, causal=False):
    wq, bq, wk, bk, wv, bv, wo, bo = params
    b, s, e = x.shape
    hd = e // n_heads
    q = (x @ wq + bq).reshape(b, s, n_heads, hd).transpose(0, 2, 1, 3)
    k = (x @ wk + bk).reshape(b, s, n_heads, hd).transpose(0, 2, 1, 3)
    v = (x @ wv + bv).reshape(b, s, n_heads, hd).transpose(0, 2, 1, 3)
    att = jnp.einsum("bhqd,bhkd->bhqk", q, k)
    if causal:
        mask = jnp.triu(jnp.ones((s, s), dtype=bool), k=1)
        att = jnp.where(mask[None, None], -jnp.inf, att)
    att = att / float(hd) ** 0.5
    att = jax.nn.softmax(att, axis=-1)
    ctx = jnp.einsum("bhqk,bhkd->bhqd", att, v)
    ctx = ctx.transpose(0, 2, 1, 3).reshape(b, s, e)
    return ctx @ wo + bo


if __name__ == "__main__":
    B, S, E, H = 2, 8, 32, 4  # batch, seq, embed_dim, n_attention_heads

    key = jax.random.PRNGKey(0)
    keys = jax.random.split(key, 9)
    x = jax.random.normal(keys[0], (B, S, E), dtype=jnp.float32)

    def init_w(k):
        return jax.random.normal(k, (E, E), dtype=jnp.float32) * 0.1

    def init_b(k):
        return jax.random.normal(k, (1, E), dtype=jnp.float32) * 0.1

    params = (init_w(keys[1]), init_b(keys[2]),   # q
              init_w(keys[3]), init_b(keys[4]),   # k
              init_w(keys[5]), init_b(keys[6]),   # v
              init_w(keys[7]), init_b(keys[8]))   # o

    # Non-causal path (default forward).
    out = jax.block_until_ready(self_attention(x, params, n_heads=H, causal=False))
    ref = _reference(x, params, H, causal=False)
    assert out.shape == (B, S, E)
    assert jnp.allclose(out, ref, atol=1e-4, rtol=1e-4), \
        f"non-causal max abs err {jnp.max(jnp.abs(out - ref))}"

    # Causal path (exercises the masking / tile-skip logic).
    out_c = jax.block_until_ready(self_attention(x, params, n_heads=H, causal=True))
    ref_c = _reference(x, params, H, causal=True)
    assert jnp.allclose(out_c, ref_c, atol=1e-4, rtol=1e-4), \
        f"causal max abs err {jnp.max(jnp.abs(out_c - ref_c))}"

    print("KERNEL_OK")
</pallas_src>

<mosaic_0001>
module attributes {stable_mosaic.version = 11 : i64} {
  func.func @_qkv_proj_kernel(%arg0: i32, %arg1: i32, %arg2: i32, %arg3: memref<16x32xf32, #tpu.memory_space<vmem>>, %arg4: memref<32x32xf32, #tpu.memory_space<vmem>>, %arg5: memref<1x32xf32, #tpu.memory_space<vmem>>, %arg6: memref<32x32xf32, #tpu.memory_space<vmem>>, %arg7: memref<1x32xf32, #tpu.memory_space<vmem>>, %arg8: memref<32x32xf32, #tpu.memory_space<vmem>>, %arg9: memref<1x32xf32, #tpu.memory_space<vmem>>, %arg10: memref<16x32xf32, #tpu.memory_space<vmem>>, %arg11: memref<16x32xf32, #tpu.memory_space<vmem>>, %arg12: memref<16x32xf32, #tpu.memory_space<vmem>>, %arg13: memref<16x32xf32, #tpu.memory_space<vmem>>, %arg14: memref<16x32xf32, #tpu.memory_space<vmem>>, %arg15: memref<16x32xf32, #tpu.memory_space<vmem>>) attributes {dimension_semantics = [#tpu.dimension_semantics<parallel>, #tpu.dimension_semantics<parallel>, #tpu.dimension_semantics<arbitrary>], iteration_bounds = array<i64: 1, 1, 1>, scalar_prefetch = 0 : i64, scratch_operands = 3 : i64, tpu.core_type = #tpu.core_type<tc>, window_params = [{transform_indices = @transform_0, window_bounds = array<i64: 16, 32>}, {transform_indices = @transform_1, window_bounds = array<i64: 32, 32>}, {transform_indices = @transform_2, window_bounds = array<i64: 1, 32>}, {transform_indices = @transform_3, window_bounds = array<i64: 32, 32>}, {transform_indices = @transform_4, window_bounds = array<i64: 1, 32>}, {transform_indices = @transform_5, window_bounds = array<i64: 32, 32>}, {transform_indices = @transform_6, window_bounds = array<i64: 1, 32>}, {transform_indices = @transform_7, window_bounds = array<i64: 16, 32>}, {transform_indices = @transform_8, window_bounds = array<i64: 16, 32>}, {transform_indices = @transform_9, window_bounds = array<i64: 16, 32>}]} {
    %c0_i32 = arith.constant 0 : i32
    %0 = arith.cmpi eq, %arg2, %c0_i32 : i32
    %1 = arith.extui %0 : i1 to i32
    %c0_i32_0 = arith.constant 0 : i32
    %2 = arith.cmpi ne, %1, %c0_i32_0 : i32
    scf.if %2 {
      %cst_24 = arith.constant 0.000000e+00 : f32
      %22 = vector.broadcast %cst_24 : f32 to vector<16x32xf32>
      %c0_25 = arith.constant 0 : index
      %c0_26 = arith.constant 0 : index
      %23 = vector.load %arg13[%c0_25, %c0_26] : memref<16x32xf32, #tpu.memory_space<vmem>>, vector<16x32xf32>
      tpu.vector_store %arg13[%c0_25, %c0_26], %22 {strides = array<i32>} : memref<16x32xf32, #tpu.memory_space<vmem>>, vector<16x32xf32>,
      %cst_27 = arith.constant 0.000000e+00 : f32
      %24 = vector.broadcast %cst_27 : f32 to vector<16x32xf32>
      %c0_28 = arith.constant 0 : index
      %c0_29 = arith.constant 0 : index
      %25 = vector.load %arg14[%c0_28, %c0_29] : memref<16x32xf32, #tpu.memory_space<vmem>>, vector<16x32xf32>
      tpu.vector_store %arg14[%c0_28, %c0_29], %24 {strides = array<i32>} : memref<16x32xf32, #tpu.memory_space<vmem>>, vector<16x32xf32>,
      %cst_30 = arith.constant 0.000000e+00 : f32
      %26 = vector.broadcast %cst_30 : f32 to vector<16x32xf32>
      %c0_31 = arith.constant 0 : index
      %c0_32 = arith.constant 0 : index
      %27 = vector.load %arg15[%c0_31, %c0_32] : memref<16x32xf32, #tpu.memory_space<vmem>>, vector<16x32xf32>
      tpu.vector_store %arg15[%c0_31, %c0_32], %26 {strides = array<i32>} : memref<16x32xf32, #tpu.memory_space<vmem>>, vector<16x32xf32>,
    } else {
    }
    %c0 = arith.constant 0 : index
    %c0_1 = arith.constant 0 : index
    %3 = vector.load %arg3[%c0, %c0_1] : memref<16x32xf32, #tpu.memory_space<vmem>>, vector<16x32xf32>
    %c0_2 = arith.constant 0 : index
    %c0_3 = arith.constant 0 : index
    %4 = vector.load %arg13[%c0_2, %c0_3] : memref<16x32xf32, #tpu.memory_space<vmem>>, vector<16x32xf32>
    %c0_4 = arith.constant 0 : index
    %c0_5 = arith.constant 0 : index
    %5 = vector.load %arg4[%c0_4, %c0_5] : memref<32x32xf32, #tpu.memory_space<vmem>>, vector<32x32xf32>
    %cst = arith.constant dense<0.000000e+00> : vector<16x32xf32>
    %6 = tpu.matmul %3, %5, %cst {dimension_numbers = #tpu.dot_dimension_numbers<[1], [0], [0], [1], [0, 0, 1, 1], [], []>} : vector<16x32xf32>, vector<32x32xf32>, vector<16x32xf32> -> vector<16x32xf32>
    %7 = arith.addf %4, %6 : vector<16x32xf32>
    %c0_6 = arith.constant 0 : index
    %c0_7 = arith.constant 0 : index
    %8 = vector.load %arg13[%c0_6, %c0_7] : memref<16x32xf32, #tpu.memory_space<vmem>>, vector<16x32xf32>
    tpu.vector_store %arg13[%c0_6, %c0_7], %7 {strides = array<i32>} : memref<16x32xf32, #tpu.memory_space<vmem>>, vector<16x32xf32>,
    %c0_8 = arith.constant 0 : index
    %c0_9 = arith.constant 0 : index
    %9 = vector.load %arg14[%c0_8, %c0_9] : memref<16x32xf32, #tpu.memory_space<vmem>>, vector<16x32xf32>
    %c0_10 = arith.constant 0 : index
    %c0_11 = arith.constant 0 : index
    %10 = vector.load %arg6[%c0_10, %c0_11] : memref<32x32xf32, #tpu.memory_space<vmem>>, vector<32x32xf32>
    %cst_12 = arith.constant dense<0.000000e+00> : vector<16x32xf32>
    %11 = tpu.matmul %3, %10, %cst_12 {dimension_numbers = #tpu.dot_dimension_numbers<[1], [0], [0], [1], [0, 0, 1, 1], [], []>} : vector<16x32xf32>, vector<32x32xf32>, vector<16x32xf32> -> vector<16x32xf32>
    %12 = arith.addf %9, %11 : vector<16x32xf32>
    %c0_13 = arith.constant 0 : index
    %c0_14 = arith.constant 0 : index
    %13 = vector.load %arg14[%c0_13, %c0_14] : memref<16x32xf32, #tpu.memory_space<vmem>>, vector<16x32xf32>
    tpu.vector_store %arg14[%c0_13, %c0_14], %12 {strides = array<i32>} : memref<16x32xf32, #tpu.memory_space<vmem>>, vector<16x32xf32>,
    %c0_15 = arith.constant 0 : index
    %c0_16 = arith.constant 0 : index
    %14 = vector.load %arg15[%c0_15, %c0_16] : memref<16x32xf32, #tpu.memory_space<vmem>>, vector<16x32xf32>
    %c0_17 = arith.constant 0 : index
    %c0_18 = arith.constant 0 : index
    %15 = vector.load %arg8[%c0_17, %c0_18] : memref<32x32xf32, #tpu.memory_space<vmem>>, vector<32x32xf32>
    %cst_19 = arith.constant dense<0.000000e+00> : vector<16x32xf32>
    %16 = tpu.matmul %3, %15, %cst_19 {dimension_numbers = #tpu.dot_dimension_numbers<[1], [0], [0], [1], [0, 0, 1, 1], [], []>} : vector<16x32xf32>, vector<32x32xf32>, vector<16x32xf32> -> vector<16x32xf32>
    %17 = arith.addf %14, %16 : vector<16x32xf32>
    %c0_20 = arith.constant 0 : index
    %c0_21 = arith.constant 0 : index
    %18 = vector.load %arg15[%c0_20, %c0_21] : memref<16x32xf32, #tpu.memory_space<vmem>>, vector<16x32xf32>
    tpu.vector_store %arg15[%c0_20, %c0_21], %17 {strides = array<i32>} : memref<16x32xf32, #tpu.memory_space<vmem>>, vector<16x32xf32>,
    %c0_i32_22 = arith.constant 0 : i32
    %19 = arith.cmpi eq, %arg2, %c0_i32_22 : i32
    %20 = arith.extui %19 : i1 to i32
    %c0_i32_23 = arith.constant 0 : i32
    %21 = arith.cmpi ne, %20, %c0_i32_23 : i32
    scf.if %21 {
      %c0_24 = arith.constant 0 : index
      %c0_25 = arith.constant 0 : index
      %22 = vector.load %arg13[%c0_24, %c0_25] : memref<16x32xf32, #tpu.memory_space<vmem>>, vector<16x32xf32>
      %c0_26 = arith.constant 0 : index
      %c0_27 = arith.constant 0 : index
      %23 = vector.load %arg5[%c0_26, %c0_27] : memref<1x32xf32, #tpu.memory_space<vmem>>, vector<1x32xf32>
      %24 = vector.broadcast %23 : vector<1x32xf32> to vector<16x32xf32>
      %25 = arith.addf %22, %24 : vector<16x32xf32>
      %cst_28 = arith.constant 0.353553385 : f32
      %26 = vector.broadcast %cst_28 : f32 to vector<16x32xf32>
      %27 = arith.mulf %25, %26 : vector<16x32xf32>
      %c0_29 = arith.constant 0 : index
      %c0_30 = arith.constant 0 : index
      %28 = vector.load %arg10[%c0_29, %c0_30] : memref<16x32xf32, #tpu.memory_space<vmem>>, vector<16x32xf32>
      tpu.vector_store %arg10[%c0_29, %c0_30], %27 {strides = array<i32>} : memref<16x32xf32, #tpu.memory_space<vmem>>, vector<16x32xf32>,
      %c0_31 = arith.constant 0 : index
      %c0_32 = arith.constant 0 : index
      %29 = vector.load %arg14[%c0_31, %c0_32] : memref<16x32xf32, #tpu.memory_space<vmem>>, vector<16x32xf32>
      %c0_33 = arith.constant 0 : index
      %c0_34 = arith.constant 0 : index
      %30 = vector.load %arg7[%c0_33, %c0_34] : memref<1x32xf32, #tpu.memory_space<vmem>>, vector<1x32xf32>
      %31 = vector.broadcast %30 : vector<1x32xf32> to vector<16x32xf32>
      %32 = arith.addf %29, %31 : vector<16x32xf32>
      %c0_35 = arith.constant 0 : index
      %c0_36 = arith.constant 0 : index
      %33 = vector.load %arg11[%c0_35, %c0_36] : memref<16x32xf32, #tpu.memory_space<vmem>>, vector<16x32xf32>
      tpu.vector_store %arg11[%c0_35, %c0_36], %32 {strides = array<i32>} : memref<16x32xf32, #tpu.memory_space<vmem>>, vector<16x32xf32>,
      %c0_37 = arith.constant 0 : index
      %c0_38 = arith.constant 0 : index
      %34 = vector.load %arg15[%c0_37, %c0_38] : memref<16x32xf32, #tpu.memory_space<vmem>>, vector<16x32xf32>
      %c0_39 = arith.constant 0 : index
      %c0_40 = arith.constant 0 : index
      %35 = vector.load %arg9[%c0_39, %c0_40] : memref<1x32xf32, #tpu.memory_space<vmem>>, vector<1x32xf32>
      %36 = vector.broadcast %35 : vector<1x32xf32> to vector<16x32xf32>
      %37 = arith.addf %34, %36 : vector<16x32xf32>
      %c0_41 = arith.constant 0 : index
      %c0_42 = arith.constant 0 : index
      %38 = vector.load %arg12[%c0_41, %c0_42] : memref<16x32xf32, #tpu.memory_space<vmem>>, vector<16x32xf32>
      tpu.vector_store %arg12[%c0_41, %c0_42], %37 {strides = array<i32>} : memref<16x32xf32, #tpu.memory_space<vmem>>, vector<16x32xf32>,
    } else {
    }
    return
  }
  func.func @transform_0(%arg0: i32, %arg1: i32, %arg2: i32) -> (i32, i32) {
    %c0_i32 = arith.constant 0 : i32
    return %arg0, %arg2 : i32, i32
  }
  func.func @transform_1(%arg0: i32, %arg1: i32, %arg2: i32) -> (i32, i32) {
    %c0_i32 = arith.constant 0 : i32
    return %arg2, %arg1 : i32, i32
  }
  func.func @transform_2(%arg0: i32, %arg1: i32, %arg2: i32) -> (i32, i32) {
    %c0_i32 = arith.constant 0 : i32
    %c0_i32_0 = arith.constant 0 : i32
    return %c0_i32, %arg1 : i32, i32
  }
  func.func @transform_3(%arg0: i32, %arg1: i32, %arg2: i32) -> (i32, i32) {
    %c0_i32 = arith.constant 0 : i32
    return %arg2, %arg1 : i32, i32
  }
  func.func @transform_4(%arg0: i32, %arg1: i32, %arg2: i32) -> (i32, i32) {
    %c0_i32 = arith.constant 0 : i32
    %c0_i32_0 = arith.constant 0 : i32
    return %c0_i32, %arg1 : i32, i32
  }
  func.func @transform_5(%arg0: i32, %arg1: i32, %arg2: i32) -> (i32, i32) {
    %c0_i32 = arith.constant 0 : i32
    return %arg2, %arg1 : i32, i32
  }
  func.func @transform_6(%arg0: i32, %arg1: i32, %arg2: i32) -> (i32, i32) {
    %c0_i32 = arith.constant 0 : i32
    %c0_i32_0 = arith.constant 0 : i32
    return %c0_i32, %arg1 : i32, i32
  }
  func.func @transform_7(%arg0: i32, %arg1: i32, %arg2: i32) -> (i32, i32) {
    %c0_i32 = arith.constant 0 : i32
    return %arg0, %arg1 : i32, i32
  }
  func.func @transform_8(%arg0: i32, %arg1: i32, %arg2: i32) -> (i32, i32) {
    %c0_i32 = arith.constant 0 : i32
    return %arg0, %arg1 : i32, i32
  }
  func.func @transform_9(%arg0: i32, %arg1: i32, %arg2: i32) -> (i32, i32) {
    %c0_i32 = arith.constant 0 : i32
    return %arg0, %arg1 : i32, i32
  }
}

</mosaic_0001>

<bundles_post_ra>
// kernel: tpu_custom_call.1
= control target key start
LH: loop header
LB: loop body
LE: loop exit
PB: predicated region body
PF: predicated region fallthrough
CT: control target
= control target key end

     0   :  { %15 = vsyncpa [#allocation6], 0  ;;  %s640_s0 = inlined_call_operand.hbm [shape: f32[16,32], index: 0, kind: input, shape index: {}]   ;;  %s641_s1 = inlined_call_operand.hbm [shape: f32[32,32], index: 1, kind: input, shape index: {}]   ;;  %s642_s2 = inlined_call_operand.vmem [shape: f32[1,32], index: 2, kind: input, shape index: {}]   ;;  %s643_s3 = inlined_call_operand.hbm [shape: f32[32,32], index: 3, kind: input, shape index: {}]   ;;  %s644_s4 = inlined_call_operand.vmem [shape: f32[1,32], index: 4, kind: input, shape index: {}]   ;;  %s645_s5 = inlined_call_operand.hbm [shape: f32[32,32], index: 5, kind: input, shape index: {}]   ;;  %s646_s6 = inlined_call_operand.vmem [shape: f32[1,32], index: 6, kind: input, shape index: {}]   ;;  %s647_s7 = inlined_call_operand.hbm [shape: f32[16,32], index: 7, kind: output, shape index: {0}]   ;;  %s648_s8 = inlined_call_operand.hbm [shape: f32[16,32], index: 8, kind: output, shape index: {1}]   ;;  %s649_s9 = inlined_call_operand.hbm [shape: f32[16,32], index: 9, kind: output, shape index: {2}]  }
   0x1   :  { %16 = vsyncpa [#allocation9], 0 }
   0x2   :  { %17 = vsyncpa [#allocation12], 0 }
   0x3   :  { %18 = vsyncpa [#allocation7], 0 }
   0x4   :  { %19 = vsyncpa [#allocation15], 0  ;;  %s37_s11 = sshll.u32 %s641_s1, 4  ;;  %s505_s12 = smov [#allocation8]   ;;  %s38_s11 = int_to_ptr.hbm [resolvable:$true] %s37_s11 }
   0x5   :  { %s39_s13 = sshll.u32 %s505_s12, 4  ;;  %s24_s16 = sshll.u32 %s640_s0, 4  ;;  %s40_s13 = int_to_ptr.vmem [resolvable:$true] %s39_s13  ;;  %s25_s16 = int_to_ptr.hbm [resolvable:$true] %s24_s16 }
   0x6   :  { %s506_s17 = smov 128   ;;  %s507_s18 = smov 8  }
   0x7   :  { %45 = dma.hbm_to_vmem [thread:$0]  %s38_s11, 512, %s40_s13, [#allocation9], %s506_s17, %s506_s17, %s507_s18  }
   0x8   :  { %s508_s19 = smov [#allocation5]   ;;  %s52_s1 = sshll.u32 %s643_s3, 4  ;;  %s53_s1 = int_to_ptr.hbm [resolvable:$true] %s52_s1 }
   0x9   :  { %s26_s20 = sshll.u32 %s508_s19, 4  ;;  %s67_s24 = sshll.u32 %s645_s5, 4  ;;  %s27_s20 = int_to_ptr.vmem [resolvable:$true] %s26_s20  ;;  %s68_s24 = int_to_ptr.hbm [resolvable:$true] %s67_s24 }
   0xa   :  { %32 = dma.hbm_to_vmem [thread:$0]  %s25_s16, 256, %s27_s20, [#allocation6], %s506_s17, %s506_s17, %s507_s18  }
   0xb   :  { %s509_s25 = smov [#allocation10]   ;;  %s510_s27 = smov [#allocation11]  }
   0xc   :  { %s54_s26 = sshll.u32 %s509_s25, 4  ;;  %s69_s3 = sshll.u32 %s510_s27, 4  ;;  %s55_s26 = int_to_ptr.vmem [resolvable:$true] %s54_s26  ;;  %s70_s3 = int_to_ptr.vmem [resolvable:$true] %s69_s3 }
   0xd   :  { %60 = dma.hbm_to_vmem [thread:$0]  %s53_s1, 512, %s55_s26, [#allocation9], %s506_s17, %s506_s17, %s507_s18  }
   0xe   :  { %75 = dma.hbm_to_vmem [thread:$0]  %s68_s24, 512, %s70_s3, [#allocation12], %s506_s17, %s506_s17, %s507_s18  }
   0xf   :  { %495 = dma.done.wait [#allocation6], 256  }
  0x10   :  { %496 = vsyncadd [#allocation6], 4294967040 }
  0x11   :  { %497 = dma.done.wait [#allocation9], 1024  }
  0x12   :  { %498 = vsyncadd [#allocation9], 4294966272 }
  0x13   :  { %499 = dma.done.wait [#allocation12], 512  }
  0x14   :  { %500 = vsyncadd [#allocation12], 4294966784  ;;  %vm98_vm0 = vcmask 261120   ;;  %v511_v0 = vmov 0.0   ;;  %v185_v1 = vld [vmem:[#allocation11 + $0x18] sm:$0xff]  ;;  %v184_v2 = vld [vmem:[#allocation11 + $0x10] sm:$0xff] }
  0x15   :  { %101 = vst.msk [vmem:[#allocation3] sm:$0xff] %vm98_vm0, %v511_v0  ;;  %198 = vmatpush.msra.mxu2 %v185_v1  ;;  %v152_v3 = vld [vmem:[#allocation10 + $0x18] sm:$0xff]  ;;  %v183_v5 = vld [vmem:[#allocation11 + $0x8] sm:$0xff]  ;;  %v151_v6 = vld [vmem:[#allocation10 + $0x10] sm:$0xff]  ;;  %s267_s14 = sshll.u32 %s648_s8, 4  ;;  %s254_s20 = sshll.u32 %s647_s7, 4  ;;  %s268_s14 = int_to_ptr.hbm [resolvable:$true] %s267_s14  ;;  %s255_s20 = int_to_ptr.hbm [resolvable:$true] %s254_s20 }
  0x16   :  { %99 = vst.msk [vmem:[#allocation2] sm:$0xff] %vm98_vm0, %v511_v0  ;;  %v112_v4 = vld [vmem:[#allocation8 + $0x18] sm:$0xff]  ;;  %165 = vmatpush.msra.mxu1 %v152_v3  ;;  %v111_v7 = vld [vmem:[#allocation8 + $0x10] sm:$0xff]  ;;  %v150_v8 = vld [vmem:[#allocation10 + $0x8] sm:$0xff]  ;;  %s514_s8 = smov [#allocation16]   ;;  %s280_s0 = sshll.u32 %s649_s9, 4  ;;  %s281_s0 = int_to_ptr.hbm [resolvable:$true] %s280_s0 }
  0x17   :  { %100 = vst.msk [vmem:[#allocation2 + $0x8] sm:$0xff] %vm98_vm0, %v511_v0  ;;  %310 = vmatpush.msra.mxu3 %v112_v4  ;;  %199 = vmatpush.msra.mxu2 %v184_v2  ;;  %v110_v9 = vld [vmem:[#allocation8 + $0x8] sm:$0xff]  ;;  %v182_v10 = vld [vmem:[#allocation11] sm:$0xff]  ;;  %v105_v11 = vld [vmem:[#allocation5] sm:$0xff]  ;;  %s278_s21 = sshll.u32 %s514_s8, 4  ;;  %s279_s21 = int_to_ptr.vmem [resolvable:$true] %s278_s21 }
  0x18   :  { %102 = vst.msk [vmem:[#allocation3 + $0x8] sm:$0xff] %vm98_vm0, %v511_v0  ;;  %132 = vmatpush.msra.mxu0 %v112_v4  ;;  %166 = vmatpush.msra.mxu1 %v151_v6  ;;  %v149_v12 = vld [vmem:[#allocation10] sm:$0xff]  ;;  %v106_v14 = vld [vmem:[#allocation5 + $0x8] sm:$0xff] }
  0x19   :  { %103 = vst.msk [vmem:[#allocation4] sm:$0xff] %vm98_vm0, %v511_v0  ;;  %311 = vmatpush.msra.mxu3 %v111_v7  ;;  %200 = vmatpush.msra.mxu2 %v183_v5  ;;  %v109_v13 = vld [vmem:[#allocation8] sm:$0xff] }
  0x1a   :  { %104 = vst.msk [vmem:[#allocation4 + $0x8] sm:$0xff] %vm98_vm0, %v511_v0  ;;  %133 = vmatpush.msra.mxu0 %v111_v7  ;;  %167 = vmatpush.msra.mxu1 %v150_v8  ;;  %v324_v27 = vld [vmem:[%s644_s4] ss:$0 sm:$0xff] }
  0x1b   :  { %312 = vmatpush.msra.mxu3 %v110_v9  ;;  %201 = vmatpush.msra.mxu2 %v182_v10  ;;  %v325_v31 = vld [vmem:[%s642_s2] ss:$0 sm:$0xff]  ;;  %s512_s2 = smov [#allocation14]  }
  0x1c   :  { %134 = vmatpush.msra.mxu0 %v110_v9  ;;  %308 = vmatmul.msk.f32.vlgmr.msra.gmra.mxu2 %vm98_vm0, %v105_v11  ;;  %v147_v15 = vld [vmem:[#allocation3] sm:$0xff]  ;;  %v326_v36 = vld [vmem:[%s646_s6] ss:$0 sm:$0xff]  ;;  %s265_s4 = sshll.u32 %s512_s2, 4  ;;  %s513_s6 = smov [#allocation13]   ;;  %s266_s4 = int_to_ptr.vmem [resolvable:$true] %s265_s4 }
  0x1d   :  { %168 = vmatpush.msra.mxu1 %v149_v12  ;;  %313 = vmatpush.msra.mxu3 %v109_v13  ;;  %v107_v17 = vld [vmem:[#allocation2] sm:$0xff]  ;;  %s252_s15 = sshll.u32 %s513_s6, 4  ;;  %s253_s15 = int_to_ptr.vmem [resolvable:$true] %s252_s15 }
  0x1e   :  { %306 = vmatmul.msk.f32.vlgmr.msra.gmra.mxu1 %vm98_vm0, %v105_v11  ;;  %305 = vmatmul.msk.f32.vlgmr.msra.gmra.mxu3 %vm98_vm0, %v106_v14  ;;  %v108_v23 = vld [vmem:[#allocation2 + $0x8] sm:$0xff] }
  0x1f   :  { %135 = vmatpush.msra.mxu0 %v109_v13  ;;  %v148_v25 = vld [vmem:[#allocation3 + $0x8] sm:$0xff] }
  0x20   :  { %304 = vmatmul.msk.f32.vlgmr.msra.gmra.mxu0 %vm98_vm0, %v105_v11  ;;  %v180_v20 = vld [vmem:[#allocation4] sm:$0xff] }
  0x21   :  { %v181_v33 = vld [vmem:[#allocation4 + $0x8] sm:$0xff] }
  0x24   :  { %309 = vmatmul.msk.f32.gmra.mxu2 %vm98_vm0, %v106_v14 }
  0x26   :  { %307 = vmatmul.msk.f32.gmra.mxu1 %vm98_vm0, %v106_v14 }
  0x9b   :  { %v170_v16 = vpop.f32.mrf.mxu1 }
  0x9c   :  { %v176_v18 = vadd.f32 %v170_v16, %v147_v15 }
  0x9d   :  { %v137_v19 = vpop.f32.mrf.mxu0 }
  0x9e   :  { %178 = vst.msk [vmem:[#allocation3] sm:$0xff] %vm98_vm0, %v176_v18  ;;  %v143_v21 = vadd.f32 %v137_v19, %v107_v17 }
  0x9f   :  { %v203_v22 = vpop.f32.mrf.mxu2 }
  0xa0   :  { %145 = vst.msk [vmem:[#allocation2] sm:$0xff] %vm98_vm0, %v143_v21  ;;  %v209_v24 = vadd.f32 %v203_v22, %v180_v20 }
  0xa1   :  { %v140_v26 = vpop.f32.mrf.mxu3 }
  0xa2   :  { %211 = vst.msk [vmem:[#allocation4] sm:$0xff] %vm98_vm0, %v209_v24  ;;  %v144_v28 = vadd.f32 %v140_v26, %v108_v23 }
  0xa3   :  { %v173_v29 = vpop.f32.mrf.mxu1 }
  0xa4   :  { %v177_v30 = vadd.f32 %v173_v29, %v148_v25  ;;  %146 = vst.msk [vmem:[#allocation2 + $0x8] sm:$0xff] %vm98_vm0, %v144_v28 }
  0xa5   :  { %v228_v32 = vld [vmem:[#allocation3] sm:$0xff] }
  0xa6   :  { %179 = vst.msk [vmem:[#allocation3 + $0x8] sm:$0xff] %vm98_vm0, %v177_v30  ;;  %v234_v34 = vadd.f32 %v324_v27, %v228_v32 }
  0xa7   :  { %v216_v35 = vld [vmem:[#allocation2] sm:$0xff]  ;;  %v206_v37 = vpop.f32.mrf.mxu2 }
  0xa8   :  { %236 = vst.msk [vmem:[#allocation14] sm:$0xff] %vm98_vm0, %v234_v34  ;;  %v222_v38 = vadd.f32 %v325_v31, %v216_v35  ;;  %v210_v39 = vadd.f32 %v206_v37, %v181_v33 }
  0xa9   :  { %v238_v41 = vld [vmem:[#allocation4] sm:$0xff] }
  0xaa   :  { %v224_v40 = vmul.f32 0.35355338, %v222_v38  ;;  %212 = vst.msk [vmem:[#allocation4 + $0x8] sm:$0xff] %vm98_vm0, %v210_v39  ;;  %v244_v42 = vadd.f32 %v326_v36, %v238_v41 }
  0xab   :  { %v217_v43 = vld [vmem:[#allocation2 + $0x8] sm:$0xff] }
  0xac   :  { %226 = vst.msk [vmem:[#allocation13] sm:$0xff] %vm98_vm0, %v224_v40  ;;  %v223_v45 = vadd.f32 %v325_v31, %v217_v43 }
  0xad   :  { %v229_v44 = vld [vmem:[#allocation3 + $0x8] sm:$0xff]  ;;  %246 = vst.msk [vmem:[#allocation16] sm:$0xff] %vm98_vm0, %v244_v42 }
  0xae   :  { %v235_v46 = vadd.f32 %v324_v27, %v229_v44  ;;  %v225_v47 = vmul.f32 0.35355338, %v223_v45 }
  0xb0   :  { %237 = vst.msk [vmem:[#allocation14 + $0x8] sm:$0xff] %vm98_vm0, %v235_v46 }
  0xb1   :  { %273 = dma.vmem_to_hbm [thread:$0]  %s266_s4, 256, %s268_s14, [#allocation15], %s506_s17, %s506_s17, %s507_s18   ;;  %227 = vst.msk [vmem:[#allocation13 + $0x8] sm:$0xff] %vm98_vm0, %v225_v47  ;;  %v239_v48 = vld [vmem:[#allocation4 + $0x8] sm:$0xff] }
  0xb2   :  { %260 = dma.vmem_to_hbm [thread:$0]  %s253_s15, 256, %s255_s20, [#allocation7], %s506_s17, %s506_s17, %s507_s18   ;;  %v245_v49 = vadd.f32 %v326_v36, %v239_v48 }
  0xb4   :  { %247 = vst.msk [vmem:[#allocation16 + $0x8] sm:$0xff] %vm98_vm0, %v245_v49 }
  0xb5   :  { %286 = dma.vmem_to_hbm [thread:$0]  %s279_s21, 256, %s281_s0, [#allocation15], %s506_s17, %s506_s17, %s507_s18  }
  0xb6   :  { %501 = dma.done.wait [#allocation7], 256  }
  0xb7   :  { %502 = vsyncadd [#allocation7], 4294967040 }
  0xb8   :  { %503 = dma.done.wait [#allocation15], 512  }
  0xb9   :  { %504 = vsyncadd [#allocation15], 4294966784 }
  0xba   :  { %299 = vsyncpa [#allocation6], 1 }
  0xbb   :  { %300 = vsyncpa [#allocation9], 1 }
  0xbc   :  { %301 = vsyncpa [#allocation12], 1 }
  0xbd   :  { %302 = vsyncpa [#allocation7], 1 }
  0xbe   :  { %303 = vsyncpa [#allocation15], 1 }

</bundles_post_ra>
